<compile_context>
chip_gen: v7x
topology: tpu7x:2x2x1
jax: 0.10.0
libtpu: 0.0.40
codegen_flags: <defaults>
</compile_context>

<pallas_src>
import jax
import jax.numpy as jnp
from jax.experimental import pallas as pl
from jax.experimental.pallas import tpu as pltpu


def fc_policy_kernel(x_ref, w1_ref, b1_ref, w2_ref, b2_ref, out_ref):
    # x_ref:  (TILE_B, state_dim) f32  (natural HBM layout; no wrapper pass)
    # w1_ref: (hidden, state_dim) bf16
    # b1_ref: (hidden, 1)         f32
    # w2_ref: (n_actions, hidden) bf16
    # b2_ref: (n_actions, 1)      f32
    # out_ref:(n_actions, TILE_B) f32  (batch-on-lanes -> lane-dense store)
    x_bf = x_ref[...].astype(jnp.bfloat16)                     # cast in-kernel

    # Hidden layer on the MXU as W1 @ x^T (contract last dims of both):
    # (H, S) x (TILE_B, S) -> (H, TILE_B), f32 accumulation.
    h = jax.lax.dot_general(
        w1_ref[...], x_bf,
        dimension_numbers=(((1,), (1,)), ((), ())),
        preferred_element_type=jnp.float32)
    h = jnp.maximum(h + b1_ref[...], 0.0)

    # Output layer: (A, H) @ (H, TILE_B) -> (A, TILE_B), f32 accumulation.
    scores = jnp.dot(w2_ref[...], h.astype(jnp.bfloat16),
                     preferred_element_type=jnp.float32) + b2_ref[...]

    # Numerically stable softmax over the action axis (axis 0 in this layout).
    # Exact normalization (cheap here) so rows sum to 1 for sampling.
    m = jnp.max(scores, axis=0, keepdims=True)
    e = jnp.exp(scores - m)
    out_ref[...] = (e / jnp.sum(e, axis=0, keepdims=True)).astype(out_ref.dtype)


def _default_tile_b(batch):
    """Large batch tile (amortize per-step overhead), multiple of 256, and
    >= 2 grid steps when the batch allows it (megacore sharding on v7x).
    VMEM stays tiny (~2 MB at tile_b=2048), well under the 32 MiB scoped
    default on every generation including v7x."""
    b_ceil = max(256, pl.cdiv(batch, 256) * 256)
    if b_ceil >= 4096:
        return 2048
    if b_ceil >= 512:
        return pl.cdiv(b_ceil // 2, 256) * 256   # exactly 2 steps
    return 256


def fc_policy_forward(x, w1, b1, w2, b2, *, tile_b=None, transpose_output=True):
    """x: (B, state_dim) f32; w1: (hidden, state_dim); b1: (hidden,);
    w2: (n_actions, hidden); b2: (n_actions,).

    Returns softmax action probabilities, (B, n_actions) f32 (PyTorch layout).
    Pass transpose_output=False to get the kernel-native (n_actions, B) layout
    and skip the trailing XLA transpose (cheaper if the consumer -- argmax /
    categorical sampling -- can take actions-major).

    tile_b: batch tile; large (2048-ish) multiples of 256 are best on all of
    v5e/v6e/v7x (kernel is DMA / per-step-overhead bound, not MXU bound).
    """
    B, state_dim = x.shape
    hidden = w1.shape[0]
    n_actions = w2.shape[0]

    if tile_b is None:
        tile_b = _default_tile_b(B)
    num_tiles = pl.cdiv(B, tile_b)
    b_pad = num_tiles * tile_b

    # Only a ragged batch needs padding (zero rows; per-column softmax -> safe,
    # sliced away below).  No transpose/cast pass over x anymore.
    x_in = x if b_pad == B else jnp.pad(x, ((0, b_pad - B), (0, 0)))

    w1_bf = w1.astype(jnp.bfloat16)                     # (hidden, state_dim)
    w2_bf = w2.astype(jnp.bfloat16)                     # (n_actions, hidden)
    b1_col = b1.reshape(hidden, 1).astype(jnp.float32)
    b2_col = b2.reshape(n_actions, 1).astype(jnp.float32)

    cost = pl.CostEstimate(
        flops=2 * b_pad * (hidden * state_dim + n_actions * hidden),
        transcendentals=b_pad * n_actions,
        bytes_accessed=(b_pad * state_dim * 4 + b_pad * n_actions * 4
                        + hidden * state_dim * 2 + n_actions * hidden * 2
                        + (hidden + n_actions) * 4),
    )

    out_t = pl.pallas_call(
        fc_policy_kernel,
        out_shape=jax.ShapeDtypeStruct((n_actions, b_pad), jnp.float32),
        grid=(num_tiles,),
        in_specs=[
            pl.BlockSpec((tile_b, state_dim), lambda i: (i, 0)),   # x, natural layout
            pl.BlockSpec((hidden, state_dim), lambda i: (0, 0)),   # W1 (resident)
            pl.BlockSpec((hidden, 1), lambda i: (0, 0)),           # b1 (resident)
            pl.BlockSpec((n_actions, hidden), lambda i: (0, 0)),   # W2 (resident)
            pl.BlockSpec((n_actions, 1), lambda i: (0, 0)),        # b2 (resident)
        ],
        out_specs=pl.BlockSpec((n_actions, tile_b), lambda i: (0, i)),
        compiler_params=pltpu.CompilerParams(
            dimension_semantics=("parallel",),     # 2 TCs on v7x; no-op v5e/v6e
            vmem_limit_bytes=32 * 1024 * 1024,     # guardrail; ~2 MB used at tile_b=2048
        ),
        cost_estimate=cost,
    )(x_in, w1_bf, b1_col, w2_bf, b2_col)

    probs_t = out_t[:, :B]                 # drop batch padding, (n_actions, B)
    if transpose_output:
        return probs_t.T                   # PyTorch-shaped (B, n_actions)
    return probs_t


def init_params(key, state_dim, n_actions, hidden=128):
    # PyTorch nn.Linear default init: U(-1/sqrt(fan_in), 1/sqrt(fan_in)),
    # stored in PyTorch layout: W (out_features, in_features), b (out_features,).
    k1, k2, k3, k4 = jax.random.split(key, 4)
    bound1 = 1.0 / jnp.sqrt(state_dim)
    bound2 = 1.0 / jnp.sqrt(hidden)
    w1 = jax.random.uniform(k1, (hidden, state_dim), jnp.float32, -bound1, bound1)
    b1 = jax.random.uniform(k2, (hidden,), jnp.float32, -bound1, bound1)
    w2 = jax.random.uniform(k3, (n_actions, hidden), jnp.float32, -bound2, bound2)
    b2 = jax.random.uniform(k4, (n_actions,), jnp.float32, -bound2, bound2)
    return w1, b1, w2, b2


if __name__ == "__main__":
    # TODO(synk): saved_log_probs / rewards lists in FCPolicy are Python-side
    # RL bookkeeping, not part of the forward compute -> not translated.
    state_dim = 16
    n_actions = 8
    batch = 2    # NOTE: for real RL workloads batch many env states per call (B >= 2048)

    key = jax.random.PRNGKey(0)
    k_x, k_p = jax.random.split(key)
    x = jax.random.normal(k_x, (batch, state_dim), jnp.float32)
    w1, b1, w2, b2 = init_params(k_p, state_dim, n_actions)

    out = fc_policy_forward(x, w1, b1, w2, b2)
    out = jax.block_until_ready(out)

    # Reference check in plain JAX (f32).  Kernel uses bf16 matmul inputs with
    # f32 accumulation, so tolerances are relaxed accordingly; normalization is
    # exact (plain divide), so row sums are tight.
    h_ref = jnp.maximum(x @ w1.T + b1, 0.0)
    scores_ref = h_ref @ w2.T + b2
    ref = jax.nn.softmax(scores_ref, axis=1)
    assert out.shape == (batch, n_actions)
    assert jnp.allclose(out, ref, atol=2e-2, rtol=2e-2)
    assert jnp.allclose(jnp.sum(out, axis=1), 1.0, atol=1e-4)

    print("KERNEL_OK")
</pallas_src>

<mosaic_0001>
module attributes {stable_mosaic.version = 11 : i64} {
  func.func @fc_policy_kernel(%arg0: i32, %arg1: memref<256x16xf32, #tpu.memory_space<vmem>>, %arg2: memref<128x16xbf16, #tpu.memory_space<vmem>>, %arg3: memref<128x1xf32, #tpu.memory_space<vmem>>, %arg4: memref<8x128xbf16, #tpu.memory_space<vmem>>, %arg5: memref<8x1xf32, #tpu.memory_space<vmem>>, %arg6: memref<8x256xf32, #tpu.memory_space<vmem>>) attributes {dimension_semantics = [#tpu.dimension_semantics<parallel>], iteration_bounds = array<i64: 1>, scalar_prefetch = 0 : i64, scratch_operands = 0 : i64, tpu.core_type = #tpu.core_type<tc>, window_params = [{transform_indices = @transform_0, window_bounds = array<i64: 256, 16>}, {pipeline_mode = #tpu.pipeline_mode<synchronous>, transform_indices = @transform_1, window_bounds = array<i64: 128, 16>}, {pipeline_mode = #tpu.pipeline_mode<synchronous>, transform_indices = @transform_2, window_bounds = array<i64: 128, 1>}, {pipeline_mode = #tpu.pipeline_mode<synchronous>, transform_indices = @transform_3, window_bounds = array<i64: 8, 128>}, {pipeline_mode = #tpu.pipeline_mode<synchronous>, transform_indices = @transform_4, window_bounds = array<i64: 8, 1>}, {transform_indices = @transform_5, window_bounds = array<i64: 8, 256>}]} {
    %c0 = arith.constant 0 : index
    %c0_0 = arith.constant 0 : index
    %0 = vector.load %arg1[%c0, %c0_0] : memref<256x16xf32, #tpu.memory_space<vmem>>, vector<256x16xf32>
    %1 = arith.truncf %0 : vector<256x16xf32> to vector<256x16xbf16>
    %c0_1 = arith.constant 0 : index
    %c0_2 = arith.constant 0 : index
    %2 = vector.load %arg2[%c0_1, %c0_2] : memref<128x16xbf16, #tpu.memory_space<vmem>>, vector<128x16xbf16>
    %cst = arith.constant dense<0.000000e+00> : vector<128x256xf32>
    %3 = tpu.matmul %2, %1, %cst {dimension_numbers = #tpu.dot_dimension_numbers<[1], [1], [0], [0], [0, 0, 1, 0], [], []>} : vector<128x16xbf16>, vector<256x16xbf16>, vector<128x256xf32> -> vector<128x256xf32>
    %c0_3 = arith.constant 0 : index
    %c0_4 = arith.constant 0 : index
    %4 = vector.load %arg3[%c0_3, %c0_4] : memref<128x1xf32, #tpu.memory_space<vmem>>, vector<128x1xf32>
    %5 = vector.broadcast %4 : vector<128x1xf32> to vector<128x256xf32>
    %6 = arith.addf %3, %5 : vector<128x256xf32>
    %cst_5 = arith.constant 0.000000e+00 : f32
    %7 = vector.broadcast %cst_5 : f32 to vector<128x256xf32>
    %8 = arith.maximumf %6, %7 : vector<128x256xf32>
    %c0_6 = arith.constant 0 : index
    %c0_7 = arith.constant 0 : index
    %9 = vector.load %arg4[%c0_6, %c0_7] : memref<8x128xbf16, #tpu.memory_space<vmem>>, vector<8x128xbf16>
    %10 = arith.truncf %8 : vector<128x256xf32> to vector<128x256xbf16>
    %cst_8 = arith.constant dense<0.000000e+00> : vector<8x256xf32>
    %11 = tpu.matmul %9, %10, %cst_8 {dimension_numbers = #tpu.dot_dimension_numbers<[1], [0], [0], [1], [0, 0, 1, 1], [], []>} : vector<8x128xbf16>, vector<128x256xbf16>, vector<8x256xf32> -> vector<8x256xf32>
    %c0_9 = arith.constant 0 : index
    %c0_10 = arith.constant 0 : index
    %12 = vector.load %arg5[%c0_9, %c0_10] : memref<8x1xf32, #tpu.memory_space<vmem>>, vector<8x1xf32>
    %13 = vector.broadcast %12 : vector<8x1xf32> to vector<8x256xf32>
    %14 = arith.addf %11, %13 : vector<8x256xf32>
    %cst_11 = arith.constant dense<0xFF800000> : vector<256xf32>
    %15 = vector.multi_reduction <maximumf>, %14, %cst_11 [0] : vector<8x256xf32> to vector<256xf32>
    %16 = vector.shape_cast %15 : vector<256xf32> to vector<1x256xf32>
    %17 = vector.broadcast %16 : vector<1x256xf32> to vector<8x256xf32>
    %18 = arith.subf %14, %17 : vector<8x256xf32>
    %19 = math.exp %18 : vector<8x256xf32>
    %cst_12 = arith.constant dense<0.000000e+00> : vector<256xf32>
    %20 = vector.multi_reduction <add>, %19, %cst_12 [0] : vector<8x256xf32> to vector<256xf32>
    %21 = vector.shape_cast %20 : vector<256xf32> to vector<1x256xf32>
    %22 = vector.broadcast %21 : vector<1x256xf32> to vector<8x256xf32>
    %23 = arith.divf %19, %22 : vector<8x256xf32>
    %c0_13 = arith.constant 0 : index
    %c0_14 = arith.constant 0 : index
    %24 = vector.load %arg6[%c0_13, %c0_14] : memref<8x256xf32, #tpu.memory_space<vmem>>, vector<8x256xf32>
    tpu.vector_store %arg6[%c0_13, %c0_14], %23 {strides = array<i32>} : memref<8x256xf32, #tpu.memory_space<vmem>>, vector<8x256xf32>,
    return
  }
  func.func @transform_0(%arg0: i32) -> (i32, i32) {
    %c0_i32 = arith.constant 0 : i32
    %c0_i32_0 = arith.constant 0 : i32
    return %arg0, %c0_i32 : i32, i32
  }
  func.func @transform_1(%arg0: i32) -> (i32, i32) {
    %c0_i32 = arith.constant 0 : i32
    %c0_i32_0 = arith.constant 0 : i32
    %c0_i32_1 = arith.constant 0 : i32
    return %c0_i32, %c0_i32_0 : i32, i32
  }
  func.func @transform_2(%arg0: i32) -> (i32, i32) {
    %c0_i32 = arith.constant 0 : i32
    %c0_i32_0 = arith.constant 0 : i32
    %c0_i32_1 = arith.constant 0 : i32
    return %c0_i32, %c0_i32_0 : i32, i32
  }
  func.func @transform_3(%arg0: i32) -> (i32, i32) {
    %c0_i32 = arith.constant 0 : i32
    %c0_i32_0 = arith.constant 0 : i32
    %c0_i32_1 = arith.constant 0 : i32
    return %c0_i32, %c0_i32_0 : i32, i32
  }
  func.func @transform_4(%arg0: i32) -> (i32, i32) {
    %c0_i32 = arith.constant 0 : i32
    %c0_i32_0 = arith.constant 0 : i32
    %c0_i32_1 = arith.constant 0 : i32
    return %c0_i32, %c0_i32_0 : i32, i32
  }
  func.func @transform_5(%arg0: i32) -> (i32, i32) {
    %c0_i32 = arith.constant 0 : i32
    %c0_i32_0 = arith.constant 0 : i32
    return %c0_i32, %arg0 : i32, i32
  }
}

</mosaic_0001>

<bundles_post_ra>
// kernel: tpu_custom_call.1
= control target key start
LH: loop header
LB: loop body
LE: loop exit
PB: predicated region body
PF: predicated region fallthrough
CT: control target
= control target key end

     0   :  { %vm222_vm0 = vcmask 130048   ;;  %v654_v7 = vmov 0   ;;  %s908_s0 = inlined_call_operand.vmem [shape: f32[256,16], index: 0, kind: input, shape index: {}]   ;;  %s909_s1 = inlined_call_operand.vmem [shape: bf16[128,16], index: 1, kind: input, shape index: {}]   ;;  %s910_s2 = inlined_call_operand.vmem [shape: f32[128,1], index: 2, kind: input, shape index: {}]   ;;  %s911_s3 = inlined_call_operand.vmem [shape: bf16[8,128], index: 3, kind: input, shape index: {}]   ;;  %s912_s4 = inlined_call_operand.vmem [shape: f32[8,1], index: 4, kind: input, shape index: {}]   ;;  %s913_s5 = inlined_call_operand.hbm [shape: f32[8,256], index: 5, kind: output, shape index: {}]  }
   0x1   :  { %v38_v0 = vld [vmem:[%s908_s0 + $0x80] sm:$0xff]  ;;  %v39_v1 = vld [vmem:[%s908_s0 + $0x88] sm:$0xff]  ;;  %v40_v5 = vld [vmem:[%s908_s0 + $0x90] sm:$0xff]  ;;  %612 = vset.pattern.permute.xlu0 %v654_v7  ;;  %613 = vset.pattern.permute.xlu1 %v654_v7 }
   0x2   :  { %v22_v2 = vld [vmem:[%s908_s0] sm:$0xff]  ;;  %v62_v3 = vpack.c.bf16 %v39_v1, %v38_v0  ;;  %v23_v4 = vld [vmem:[%s908_s0 + $0x8] sm:$0xff]  ;;  %v41_v6 = vld [vmem:[%s908_s0 + $0x98] sm:$0xff]  ;;  %495 = vmatprep.mubr.bf16.mxu1 %v654_v7 }
   0x3   :  { %v54_v8 = vpack.c.bf16 %v23_v4, %v22_v2  ;;  %v63_v9 = vpack.c.bf16 %v41_v6, %v40_v5  ;;  %v24_v10 = vld [vmem:[%s908_s0 + $0x10] sm:$0xff]  ;;  %v25_v11 = vld [vmem:[%s908_s0 + $0x18] sm:$0xff]  ;;  %v42_v14 = vld [vmem:[%s908_s0 + $0xa0] sm:$0xff] }
   0x4   :  { %602 = vmatprep.subr.msk.bf16.mxu0 %vm222_vm0, %v62_v3  ;;  %v55_v13 = vpack.c.bf16 %v25_v11, %v24_v10  ;;  %v43_v15 = vld [vmem:[%s908_s0 + $0xa8] sm:$0xff]  ;;  %v26_v18 = vld [vmem:[%s908_s0 + $0x20] sm:$0xff]  ;;  %v44_v22 = vld [vmem:[%s908_s0 + $0xb0] sm:$0xff] }
   0x5   :  { %v248_v12 = vsel %vm222_vm0, %v54_v8, 0  ;;  %v64_v17 = vpack.c.bf16 %v43_v15, %v42_v14  ;;  %v27_v19 = vld [vmem:[%s908_s0 + $0x28] sm:$0xff]  ;;  %v729_v20 = vld [vmem:[%s909_s1] sm:$0xff]   ;;  %v45_v23 = vld [vmem:[%s908_s0 + $0xb8] sm:$0xff] }
   0x6   :  { %571 = vmatpush3.bf16.xpose.msra.mxu0 %v248_v12  ;;  %v251_v16 = vsel %vm222_vm0, %v55_v13, 0  ;;  %586 = vmatprep.mubr.msk.bf16.mxu0 %vm222_vm0, %v729_v20  ;;  %v56_v21 = vpack.c.bf16 %v27_v19, %v26_v18  ;;  %v65_v25 = vpack.c.bf16 %v45_v23, %v44_v22  ;;  %v86_v26 = vld [vmem:[%s910_s2] sm:$0xff]  ;;  %v28_v27 = vld [vmem:[%s908_s0 + $0x30] sm:$0xff]  ;;  %v29_v28 = vld [vmem:[%s908_s0 + $0x38] sm:$0xff] }
   0x7   :  { %603 = vmatprep.subr.msk.bf16.mxu0 %vm222_vm0, %v63_v9  ;;  %104 = vperm.xlu0 %612, %v86_v26   ;;  %v88_v29 = vld [vmem:[%s910_s2 + $0x10] sm:$0xff]  ;;  %v87_v30 = vld [vmem:[%s910_s2 + $0x8] sm:$0xff]  ;;  %v89_v31 = vld [vmem:[%s910_s2 + $0x18] sm:$0xff]  ;;  %v57_v32 = vpack.c.bf16 %v29_v28, %v28_v27 }
   0x8   :  { %v254_v24 = vsel %vm222_vm0, %v56_v21, 0  ;;  %114 = vperm.xlu1 %613, %v88_v29   ;;  %v46_v33 = vld [vmem:[%s908_s0 + $0xc0] sm:$0xff]  ;;  %v47_v34 = vld [vmem:[%s908_s0 + $0xc8] sm:$0xff] }
   0x9   :  { %v90_v35 = vld [vmem:[%s910_s2 + $0x20] sm:$0xff] }
   0xb   :  { %109 = vperm.xlu0 %612, %v87_v30  }
   0xc   :  { %119 = vperm.xlu1 %613, %v89_v31  }
   0xe   :  { %573 = vmatpush3.bf16.xpose.msra.mxu0 %v251_v16 }
   0xf   :  { %604 = vmatprep.subr.msk.bf16.mxu0 %vm222_vm0, %v64_v17 }
  0x16   :  { %575 = vmatpush3.bf16.xpose.msra.mxu0 %v254_v24 }
  0x17   :  { %605 = vmatprep.subr.msk.bf16.mxu0 %vm222_vm0, %v65_v25 }
  0x18   :  { %10 = vsyncpa [#allocation3], 0  ;;  %v91_v36 = vld [vmem:[%s910_s2 + $0x28] sm:$0xff]  ;;  %v257_v37 = vsel %vm222_vm0, %v57_v32, 0  ;;  %v66_v38 = vpack.c.bf16 %v47_v34, %v46_v33  ;;  %v30_v39 = vld [vmem:[%s908_s0 + $0x40] sm:$0xff]  ;;  %124 = vperm.xlu0 %612, %v90_v35  }
  0x19   :  { %v31_v40 = vld [vmem:[%s908_s0 + $0x48] sm:$0xff]  ;;  %v92_v41 = vld [vmem:[%s910_s2 + $0x30] sm:$0xff]  ;;  %129 = vperm.xlu1 %613, %v91_v36   ;;  %v93_v42 = vld [vmem:[%s910_s2 + $0x38] sm:$0xff] }
  0x1a   :  { %v58_v43 = vpack.c.bf16 %v31_v40, %v30_v39  ;;  %v48_v44 = vld [vmem:[%s908_s0 + $0xd0] sm:$0xff]  ;;  %v49_v45 = vld [vmem:[%s908_s0 + $0xd8] sm:$0xff]  ;;  %v94_v46 = vld [vmem:[%s910_s2 + $0x40] sm:$0xff] }
  0x1b   :  { %v95_v47 = vld [vmem:[%s910_s2 + $0x48] sm:$0xff]  ;;  %v67_v49 = vpack.c.bf16 %v49_v45, %v48_v44  ;;  %v32_v50 = vld [vmem:[%s908_s0 + $0x50] sm:$0xff]  ;;  %v33_v51 = vld [vmem:[%s908_s0 + $0x58] sm:$0xff] }
  0x1c   :  { %134 = vperm.xlu0 %612, %v92_v41   ;;  %v260_v48 = vsel %vm222_vm0, %v58_v43, 0  ;;  %v96_v52 = vld [vmem:[%s910_s2 + $0x50] sm:$0xff]  ;;  %v97_v53 = vld [vmem:[%s910_s2 + $0x58] sm:$0xff]  ;;  %v59_v54 = vpack.c.bf16 %v33_v51, %v32_v50  ;;  %v50_v55 = vld [vmem:[%s908_s0 + $0xe0] sm:$0xff] }
  0x1d   :  { %139 = vperm.xlu1 %613, %v93_v42   ;;  %v51_v56 = vld [vmem:[%s908_s0 + $0xe8] sm:$0xff]  ;;  %v98_v57 = vld [vmem:[%s910_s2 + $0x60] sm:$0xff]  ;;  %v100_v63 = vld [vmem:[%s910_s2 + $0x70] sm:$0xff] }
  0x1e   :  { %577 = vmatpush3.bf16.xpose.msra.mxu0 %v257_v37  ;;  %v99_v58 = vld [vmem:[%s910_s2 + $0x68] sm:$0xff]  ;;  %v263_v59 = vsel %vm222_vm0, %v59_v54, 0  ;;  %v68_v60 = vpack.c.bf16 %v51_v56, %v50_v55  ;;  %v34_v61 = vld [vmem:[%s908_s0 + $0x60] sm:$0xff]  ;;  %v101_v0 = vld [vmem:[%s910_s2 + $0x78] sm:$0xff] }
  0x1f   :  { %606 = vmatprep.subr.msk.bf16.mxu0 %vm222_vm0, %v66_v38  ;;  %v35_v62 = vld [vmem:[%s908_s0 + $0x68] sm:$0xff]  ;;  %v52_v2 = vld [vmem:[%s908_s0 + $0xf0] sm:$0xff]  ;;  %v53_v3 = vld [vmem:[%s908_s0 + $0xf8] sm:$0xff] }
  0x20   :  { %144 = vperm.xlu0 %612, %v94_v46   ;;  %v60_v1 = vpack.c.bf16 %v35_v62, %v34_v61  ;;  %v457_v4 = vld [vmem:[%s912_s4] sm:$0xff]  ;;  %v69_v6 = vpack.c.bf16 %v53_v3, %v52_v2  ;;  %v36_v7 = vld [vmem:[%s908_s0 + $0x70] sm:$0xff]  ;;  %v37_v8 = vld [vmem:[%s908_s0 + $0x78] sm:$0xff] }
  0x21   :  { %149 = vperm.xlu1 %613, %v95_v47   ;;  %v61_v9 = vpack.c.bf16 %v37_v8, %v36_v7  ;;  %v615_v11 = vld [vmem:[%s909_s1 + $0x8] sm:$0xff]   ;;  %v616_v12 = vld [vmem:[%s909_s1 + $0x10] sm:$0xff]   ;;  %v617_v13 = vld [vmem:[%s909_s1 + $0x18] sm:$0xff]  }
  0x22   :  { %v266_v5 = vsel %vm222_vm0, %v60_v1, 0  ;;  %v618_v14 = vld [vmem:[%s909_s1 + $0x20] sm:$0xff]   ;;  %v619_v15 = vld [vmem:[%s909_s1 + $0x28] sm:$0xff]   ;;  %v620_v16 = vld [vmem:[%s909_s1 + $0x30] sm:$0xff]  }
  0x23   :  { %v269_v10 = vsel %vm222_vm0, %v61_v9, 0  ;;  %v621_v17 = vld [vmem:[%s909_s1 + $0x38] sm:$0xff]  }
  0x24   :  { %154 = vperm.xlu0 %612, %v96_v52  }
  0x25   :  { %159 = vperm.xlu1 %613, %v97_v53  }
  0x26   :  { %579 = vmatpush3.bf16.xpose.msra.mxu0 %v260_v48 }
  0x27   :  { %607 = vmatprep.subr.msk.bf16.mxu0 %vm222_vm0, %v67_v49 }
  0x28   :  { %164 = vperm.xlu0 %612, %v98_v57  }
  0x29   :  { %169 = vperm.xlu1 %613, %v99_v58  }
  0x2c   :  { %174 = vperm.xlu0 %612, %v100_v63  }
  0x2d   :  { %179 = vperm.xlu1 %613, %v101_v0  }
  0x2e   :  { %581 = vmatpush3.bf16.xpose.msra.mxu0 %v263_v59 }
  0x2f   :  { %608 = vmatprep.subr.msk.bf16.mxu0 %vm222_vm0, %v68_v60 }
  0x30   :  { %460 = vperm.xlu0 %612, %v457_v4  }
  0x36   :  { %583 = vmatpush3.bf16.xpose.msra.mxu0 %v266_v5 }
  0x37   :  { %609 = vmatprep.subr.msk.bf16.mxu0 %vm222_vm0, %v69_v6 }
  0x3e   :  { %585 = vmatpush3.bf16.xpose.msra.mxu0 %v269_v10 }
  0x45   :  { %587 = vmatmul.mubr.msk.bf16.vlgmr.msra.gmra.mrb[0].mxu0 %vm222_vm0, %v729_v20 }
  0x46   :  { %588 = vmatprep.mubr.msk.bf16.mxu0 %vm222_vm0, %v615_v11 }
  0x4d   :  { %589 = vmatmul.mubr.msk.bf16.gmra.mrb[4].mxu0 %vm222_vm0, %v615_v11 }
  0x4e   :  { %590 = vmatprep.mubr.msk.bf16.mxu0 %vm222_vm0, %v616_v12 }
  0x55   :  { %591 = vmatmul.mubr.msk.bf16.gmra.mrb[8].mxu0 %vm222_vm0, %v616_v12 }
  0x56   :  { %592 = vmatprep.mubr.msk.bf16.mxu0 %vm222_vm0, %v617_v13 }
  0x5d   :  { %593 = vmatmul.mubr.msk.bf16.gmra.mrb[12].mxu0 %vm222_vm0, %v617_v13 }
  0x5e   :  { %594 = vmatprep.mubr.msk.bf16.mxu0 %vm222_vm0, %v618_v14 }
  0x65   :  { %595 = vmatmul.mubr.msk.bf16.gmra.mrb[16].mxu0 %vm222_vm0, %v618_v14 }
  0x66   :  { %596 = vmatprep.mubr.msk.bf16.mxu0 %vm222_vm0, %v619_v15 }
  0x6d   :  { %597 = vmatmul.mubr.msk.bf16.gmra.mrb[20].mxu0 %vm222_vm0, %v619_v15 }
  0x6e   :  { %598 = vmatprep.mubr.msk.bf16.mxu0 %vm222_vm0, %v620_v16 }
  0x75   :  { %599 = vmatmul.mubr.msk.bf16.gmra.mrb[24].mxu0 %vm222_vm0, %v620_v16 }
  0x76   :  { %600 = vmatprep.mubr.msk.bf16.mxu0 %vm222_vm0, %v621_v17 }
  0x7d   :  { %601 = vmatmul.mubr.msk.bf16.gmra.mrb[28].mxu0 %vm222_vm0, %v621_v17 }
  0x86   :  { %v105_v18 = vpop.permute.xlu0 %104 }
  0x87   :  { %v115_v27 = vpop.permute.xlu1 %114 }
  0x8a   :  { %v110_v22 = vpop.permute.xlu0 %109 }
  0x8b   :  { %v120_v38 = vpop.permute.xlu1 %119 }
  0x97   :  { %v125_v49 = vpop.permute.xlu0 %124 }
  0x98   :  { %v130_v54 = vpop.permute.xlu1 %129 }
  0x9b   :  { %v135_v1 = vpop.permute.xlu0 %134 }
  0x9c   :  { %v140_v6 = vpop.permute.xlu1 %139 }
  0x9f   :  { %v145_v17 = vpop.permute.xlu0 %144 }
 0x118   :  { %v329_v19 = vpop.f32.mrb[0].mxu0 }
 0x119   :  { %v330_v20 = vadd.f32 %v329_v19, %v105_v18  ;;  %v331_v21 = vpop.f32.mrb[1].mxu0 }
 0x11a   :  { %v332_v23 = vadd.f32 %v331_v21, %v105_v18  ;;  %v333_v24 = vpop.f32.mrb[2].mxu0 }
 0x11b   :  { %v334_v25 = vadd.f32 %v333_v24, %v110_v22  ;;  %v335_v26 = vpop.f32.mrb[3].mxu0  ;;  %v408_v29 = vmax.f32 %v330_v20, 0.0 }
 0x11c   :  { %v336_v28 = vadd.f32 %v335_v26, %v110_v22  ;;  %v409_v31 = vmax.f32 %v332_v23, 0.0  ;;  %v150_v22 = vpop.permute.xlu1 %149 }
 0x11d   :  { %v410_v30 = vmax.f32 %v334_v25, 0.0 }
 0x11e   :  { %v411_v32 = vmax.f32 %v336_v28, 0.0 }
 0x11f   :  { %v441_v33 = vpack.c.bf16 %v410_v30, %v408_v29 }
 0x120   :  { %v339_v34 = vpop.f32.mrb[4].mxu0  ;;  %v442_v35 = vpack.c.bf16 %v411_v32, %v409_v31 }
 0x121   :  { %v340_v36 = vadd.f32 %v339_v34, %v115_v27  ;;  %v341_v37 = vpop.f32.mrb[5].mxu0 }
 0x122   :  { %v342_v39 = vadd.f32 %v341_v37, %v115_v27  ;;  %v343_v40 = vpop.f32.mrb[6].mxu0  ;;  %463 = vmatprep.subr.bf16.mxu1 %v442_v35 }
 0x123   :  { %v344_v41 = vadd.f32 %v343_v40, %v120_v38  ;;  %v345_v42 = vpop.f32.mrb[7].mxu0  ;;  %464 = vmatpush1.bf16.msra.mxu1 %v441_v33  ;;  %v412_v44 = vmax.f32 %v340_v36, 0.0  ;;  %v155_v33 = vpop.permute.xlu0 %154 }
 0x124   :  { %v346_v43 = vadd.f32 %v345_v42, %v120_v38  ;;  %v413_v46 = vmax.f32 %v342_v39, 0.0  ;;  %v160_v38 = vpop.permute.xlu1 %159 }
 0x125   :  { %v414_v45 = vmax.f32 %v344_v41, 0.0 }
 0x126   :  { %v415_v47 = vmax.f32 %v346_v43, 0.0 }
 0x127   :  { %v443_v48 = vpack.c.bf16 %v414_v45, %v412_v44 }
 0x128   :  { %v444_v50 = vpack.c.bf16 %v415_v47, %v413_v46  ;;  %v349_v51 = vpop.f32.mrb[8].mxu0 }
 0x129   :  { %v350_v52 = vadd.f32 %v349_v51, %v125_v49  ;;  %v351_v53 = vpop.f32.mrb[9].mxu0 }
 0x12a   :  { %v352_v55 = vadd.f32 %v351_v53, %v125_v49  ;;  %v353_v56 = vpop.f32.mrb[10].mxu0  ;;  %465 = vmatprep.subr.bf16.mxu1 %v444_v50  ;;  %v165_v49 = vpop.permute.xlu0 %164 }
 0x12b   :  { %v354_v57 = vadd.f32 %v353_v56, %v130_v54  ;;  %v355_v58 = vpop.f32.mrb[11].mxu0  ;;  %466 = vmatpush1.bf16.msra.mxu1 %v443_v48  ;;  %v416_v60 = vmax.f32 %v350_v52, 0.0 }
 0x12c   :  { %v356_v59 = vadd.f32 %v355_v58, %v130_v54  ;;  %v417_v62 = vmax.f32 %v352_v55, 0.0  ;;  %v170_v54 = vpop.permute.xlu1 %169 }
 0x12d   :  { %v418_v61 = vmax.f32 %v354_v57, 0.0 }
 0x12e   :  { %v419_v63 = vmax.f32 %v356_v59, 0.0 }
 0x12f   :  { %v445_v0 = vpack.c.bf16 %v418_v61, %v416_v60 }
 0x130   :  { %v446_v2 = vpack.c.bf16 %v419_v63, %v417_v62  ;;  %v359_v3 = vpop.f32.mrb[12].mxu0 }
 0x131   :  { %v360_v4 = vadd.f32 %v359_v3, %v135_v1  ;;  %v361_v5 = vpop.f32.mrb[13].mxu0 }
 0x132   :  { %v362_v7 = vadd.f32 %v361_v5, %v135_v1  ;;  %v363_v8 = vpop.f32.mrb[14].mxu0  ;;  %467 = vmatprep.subr.bf16.mxu1 %v446_v2  ;;  %v175_v1 = vpop.permute.xlu0 %174 }
 0x133   :  { %v364_v9 = vadd.f32 %v363_v8, %v140_v6  ;;  %v365_v10 = vpop.f32.mrb[15].mxu0  ;;  %468 = vmatpush1.bf16.msra.mxu1 %v445_v0  ;;  %v420_v12 = vmax.f32 %v360_v4, 0.0 }
 0x134   :  { %v366_v11 = vadd.f32 %v365_v10, %v140_v6  ;;  %v421_v14 = vmax.f32 %v362_v7, 0.0  ;;  %v180_v6 = vpop.permute.xlu1 %179 }
 0x135   :  { %v422_v13 = vmax.f32 %v364_v9, 0.0 }
 0x136   :  { %v423_v15 = vmax.f32 %v366_v11, 0.0 }
 0x137   :  { %v447_v16 = vpack.c.bf16 %v422_v13, %v420_v12 }
 0x138   :  { %v448_v18 = vpack.c.bf16 %v423_v15, %v421_v14  ;;  %v369_v19 = vpop.f32.mrb[16].mxu0 }
 0x139   :  { %v370_v20 = vadd.f32 %v369_v19, %v145_v17  ;;  %v371_v21 = vpop.f32.mrb[17].mxu0  ;;  %v461_v19 = vpop.permute.xlu0 %460 }
 0x13a   :  { %v372_v23 = vadd.f32 %v371_v21, %v145_v17  ;;  %v373_v24 = vpop.f32.mrb[18].mxu0  ;;  %469 = vmatprep.subr.bf16.mxu1 %v448_v18  ;;  %v440_v18 = vld [vmem:[%s911_s3] sm:$0xf]  ;;  %s655_s3 = smov [#allocation2]  }
 0x13b   :  { %v374_v25 = vadd.f32 %v373_v24, %v150_v22  ;;  %v375_v26 = vpop.f32.mrb[19].mxu0  ;;  %470 = vmatpush1.bf16.msra.mxu1 %v447_v16  ;;  %v424_v28 = vmax.f32 %v370_v20, 0.0  ;;  %s546_s30 = sshll.u32 %s655_s3, 4  ;;  %s547_s30 = int_to_ptr.vmem [resolvable:$true] %s546_s30 }
 0x13c   :  { %v376_v27 = vadd.f32 %v375_v26, %v150_v22  ;;  %v425_v30 = vmax.f32 %v372_v23, 0.0  ;;  %s630_s6 = scalar_lea.vmem %s547_s30, 256  ;;  %p635_p1 = scmp.lt.s32.totalorder %s547_s30, %s547_s30 }
 0x13d   :  { %v426_v29 = vmax.f32 %v374_v25, 0.0  ;;  %p631_p0 = scmp.ne.s32.totalorder %s547_s30, %s630_s6  ;;  %p636_p2 = scmp.lt.s32.totalorder %s630_s6, %s630_s6 }
 0x13e   :  { %v427_v31 = vmax.f32 %v376_v27, 0.0 }
 0x13f   :  { %v449_v32 = vpack.c.bf16 %v426_v29, %v424_v28  ;;  %p637_p3 = por %p636_p2, %p635_p1 }
 0x140   :  { %v450_v34 = vpack.c.bf16 %v427_v31, %v425_v30  ;;  %v379_v35 = vpop.f32.mrb[20].mxu0 }
 0x141   :  { %v380_v36 = vadd.f32 %v379_v35, %v155_v33  ;;  %v381_v37 = vpop.f32.mrb[21].mxu0  ;;  %p638_p4 = pnand %p637_p3, %p631_p0 }
 0x142   :  { %v382_v39 = vadd.f32 %v381_v37, %v155_v33  ;;  %v383_v40 = vpop.f32.mrb[22].mxu0  ;;  %471 = vmatprep.subr.bf16.mxu1 %v450_v34 }
 0x143   :  { %v384_v41 = vadd.f32 %v383_v40, %v160_v38  ;;  %v385_v42 = vpop.f32.mrb[23].mxu0  ;;  %472 = vmatpush1.bf16.msra.mxu1 %v449_v32  ;;  %v428_v44 = vmax.f32 %v380_v36, 0.0 }
 0x144   :  { %v386_v43 = vadd.f32 %v385_v42, %v160_v38  ;;  %v429_v46 = vmax.f32 %v382_v39, 0.0 }
 0x145   :  { %v430_v45 = vmax.f32 %v384_v41, 0.0 }
 0x146   :  { %v431_v47 = vmax.f32 %v386_v43, 0.0 }
 0x147   :  { %v451_v48 = vpack.c.bf16 %v430_v45, %v428_v44 }
 0x148   :  { %v452_v50 = vpack.c.bf16 %v431_v47, %v429_v46  ;;  %v389_v51 = vpop.f32.mrb[24].mxu0 }
 0x149   :  { %v390_v52 = vadd.f32 %v389_v51, %v165_v49  ;;  %v391_v53 = vpop.f32.mrb[25].mxu0 }
 0x14a   :  { %v392_v55 = vadd.f32 %v391_v53, %v165_v49  ;;  %v393_v56 = vpop.f32.mrb[26].mxu0  ;;  %473 = vmatprep.subr.bf16.mxu1 %v452_v50 }
 0x14b   :  { %v394_v57 = vadd.f32 %v393_v56, %v170_v54  ;;  %v395_v58 = vpop.f32.mrb[27].mxu0  ;;  %474 = vmatpush1.bf16.msra.mxu1 %v451_v48  ;;  %v432_v60 = vmax.f32 %v390_v52, 0.0 }
 0x14c   :  { %v396_v59 = vadd.f32 %v395_v58, %v170_v54  ;;  %v433_v62 = vmax.f32 %v392_v55, 0.0 }
 0x14d   :  { %v434_v61 = vmax.f32 %v394_v57, 0.0 }
 0x14e   :  { %v435_v63 = vmax.f32 %v396_v59, 0.0 }
 0x14f   :  { %v453_v0 = vpack.c.bf16 %v434_v61, %v432_v60 }
 0x150   :  { %v454_v2 = vpack.c.bf16 %v435_v63, %v433_v62  ;;  %v399_v3 = vpop.f32.mrb[28].mxu0 }
 0x151   :  { %v400_v4 = vadd.f32 %v399_v3, %v175_v1  ;;  %v401_v5 = vpop.f32.mrb[29].mxu0 }
 0x152   :  { %v402_v7 = vadd.f32 %v401_v5, %v175_v1  ;;  %v403_v8 = vpop.f32.mrb[30].mxu0  ;;  %475 = vmatprep.subr.bf16.mxu1 %v454_v2 }
 0x153   :  { %v404_v9 = vadd.f32 %v403_v8, %v180_v6  ;;  %v405_v10 = vpop.f32.mrb[31].mxu0  ;;  %476 = vmatpush1.bf16.msra.mxu1 %v453_v0  ;;  %v436_v12 = vmax.f32 %v400_v4, 0.0 }
 0x154   :  { %v406_v11 = vadd.f32 %v405_v10, %v180_v6  ;;  %v437_v14 = vmax.f32 %v402_v7, 0.0 }
 0x155   :  { %v438_v13 = vmax.f32 %v404_v9, 0.0 }
 0x156   :  { %v439_v15 = vmax.f32 %v406_v11, 0.0 }
 0x157   :  { %v455_v16 = vpack.c.bf16 %v438_v13, %v436_v12 }
 0x158   :  { %v456_v17 = vpack.c.bf16 %v439_v15, %v437_v14 }
 0x15a   :  { %477 = vmatprep.subr.bf16.mxu1 %v456_v17 }
 0x15b   :  { %478 = vmatpush1.bf16.msra.mxu1 %v455_v16 }
 0x15e   :  { %496 = vmatmul.mubr.bf16.vlgmr.msra.gmra.mrb[0].mxu1 %v440_v18 }
 0x231   :  { %v497_v20 = vpop.f32.mrb[0].mxu1 }
 0x232   :  { %v498_v21 = vadd.f32 %v497_v20, %v461_v19  ;;  %v499_v22 = vpop.f32.mrb[1].mxu1 }
 0x233   :  { %v500_v23 = vadd.f32 %v499_v22, %v461_v19  ;;  %v501_v24 = vpop.f32.mrb[2].mxu1 }
 0x234   :  { %v504_v25 = vrot.slane %v498_v21, 4  ;;  %v502_v26 = vpop.f32.mrb[3].mxu1 }
 0x235   :  { %v510_v27 = vrot.slane %v500_v23, 4 }
 0x236   :  { %v505_v28 = vmax.f32 %v498_v21, %v504_v25 }
 0x237   :  { %v511_v29 = vmax.f32 %v500_v23, %v510_v27 }
 0x238   :  { %v506_v30 = vrot.slane %v505_v28, 2 }
 0x239   :  { %v512_v31 = vrot.slane %v511_v29, 2 }
 0x23a   :  { %v507_v32 = vmax.f32 %v505_v28, %v506_v30 }
 0x23b   :  { %v513_v33 = vmax.f32 %v511_v29, %v512_v31 }
 0x23c   :  { %v508_v34 = vrot.slane %v507_v32, 1 }
 0x23d   :  { %v514_v35 = vrot.slane %v513_v33, 1 }
 0x23e   :  { %v509_v36 = vmax.f32 %v507_v32, %v508_v34 }
 0x23f   :  { %v515_v37 = vmax.f32 %v513_v33, %v514_v35 }
 0x240   :  { %v516_v38 = vsub.f32 %v498_v21, %v509_v36 }
 0x241   :  { %v517_v39 = vsub.f32 %v500_v23, %v515_v37 }
 0x242   :  { %v518_v40 = vmul.f32 1.442695, %v516_v38 }
 0x243   :  { %v520_v41 = vmul.f32 1.442695, %v517_v39 }
 0x244   :  { %622 = vpow2.f32 %v518_v40 }
 0x245   :  { %624 = vpow2.f32 %v520_v41 }
 0x24e   :  { %v623_v42 = vpop.eup %622 }
 0x24f   :  { %v625_v43 = vpop.eup %624  ;;  %v522_v44 = vrot.slane %v623_v42, 4 }
 0x250   :  { %v528_v45 = vrot.slane %v625_v43, 4 }
 0x251   :  { %v523_v46 = vadd.f32 %v623_v42, %v522_v44 }
 0x252   :  { %v529_v47 = vadd.f32 %v625_v43, %v528_v45 }
 0x253   :  { %v524_v48 = vrot.slane %v523_v46, 2 }
 0x254   :  { %v530_v49 = vrot.slane %v529_v47, 2 }
 0x255   :  { %v525_v50 = vadd.f32 %v524_v48, %v523_v46 }
 0x256   :  { %v531_v51 = vadd.f32 %v530_v49, %v529_v47 }
 0x257   :  { %v526_v52 = vrot.slane %v525_v50, 1 }
 0x258   :  { %v532_v53 = vrot.slane %v531_v51, 1 }
 0x259   :  { %v527_v54 = vadd.f32 %v526_v52, %v525_v50 }
 0x25a   :  { %v533_v55 = vadd.f32 %v532_v53, %v531_v51 }
 0x25b   :  { %626 = vrcp.f32 %v527_v54 }
 0x25c   :  { %628 = vrcp.f32 %v533_v55 }
 0x265   :  { %v627_v56 = vpop.eup %626 }
 0x266   :  { %v629_v57 = vpop.eup %628  ;;  %v535_v58 = vmul.f32 %v627_v56, %v623_v42 }
 0x267   :  { %v537_v59 = vmul.f32 %v629_v57, %v625_v43 }
 0x268   :  { %538 = vst [vmem:[#allocation2] sm:$0xff] %v535_v58 }
 0x269   :  { %539 = vst [vmem:[#allocation2 + $0x8] sm:$0xff] %v537_v59 }
 0x26a   :  { %641 = shalt.err (!%p638_p4)
}
 0x26b   :  { %s642_s9 = scalar_lea.hbm %s913_s5, 256 }
 0x26c   :  { %p643_p5 = scmp.ne.s32.totalorder %s913_s5, %s642_s9  ;;  %p646_p6 = scmp.lt.u32.totalorder %s642_s9, %s913_s5 }
 0x26e   :  { %p648_p7 = pnand %p646_p6, %p643_p5 }
 0x270   :  { %651 = shalt.err (!%p648_p7)
}
 0x271   :  { %549 = dma.vmem_to_hbm [thread:$0]  %s547_s30, 256, %s913_s5, [#allocation3]  }
 0x272   :  { %652 = dma.done.wait [#allocation3], 256  }
 0x273   :  { %653 = vsyncadd [#allocation3], 4294967040 }
 0x274   :  { %553 = vsyncpa [#allocation3], 1 }

</bundles_post_ra>
